<compile_context>
chip_gen: v7x
topology: tpu7x:2x2x1
jax: 0.10.0
libtpu: 0.0.40
codegen_flags: <defaults>
</compile_context>

<pallas_src>
import jax
import jax.numpy as jnp
from jax.experimental import pallas as pl
from jax.experimental.pallas import tpu as pltpu

HIDDEN = 512
OUT = 4
OUT_PAD = 128      # fc3 weight lane-padded width (MXU wants >=128 output lanes)
OUT_STORE = 8      # stored output width (>= OUT); shrinks output HBM writeback
MAX_TILE_M = 512   # max batch rows per grid step


def _round_up(x, m):
    return ((x + m - 1) // m) * m


def _choose_tiling(batch):
    """Balanced batch tiles with minimal padding.

    >=2 tiles whenever batch is non-trivial so the 'parallel' grid axis can
    occupy both TensorCores on v7x (neutral on single-TC v5e/v6e)."""
    num_tiles = -(-batch // MAX_TILE_M)
    if batch > 32:
        num_tiles = max(num_tiles, 2)
    tile_m = _round_up(-(-batch // num_tiles), 8)
    return tile_m, num_tiles, tile_m * num_tiles


def mlp_kernel(x_ref, w1_ref, b1_ref, w2_ref, b2_ref, w3_ref, b3_ref, o_ref):
    # fc1 + ReLU  (bf16 matmul operands, f32 accumulation / bias / ReLU)
    x = x_ref[...].astype(jnp.bfloat16)
    h1 = jnp.dot(x, w1_ref[...], preferred_element_type=jnp.float32)
    h1 = jnp.maximum(h1 + b1_ref[...], 0.0)
    # fc2 + ReLU
    h2 = jnp.dot(h1.astype(jnp.bfloat16), w2_ref[...],
                 preferred_element_type=jnp.float32)
    h2 = jnp.maximum(h2 + b2_ref[...], 0.0)
    # fc3: matmul at N=OUT_PAD (MXU-shaped), store only the first OUT_STORE lanes
    o = jnp.dot(h2.astype(jnp.bfloat16), w3_ref[...],
                preferred_element_type=jnp.float32)
    o_ref[...] = (o[:, :OUT_STORE] + b3_ref[...]).astype(o_ref.dtype)


@jax.jit
def neural_net_forward(x, params):
    """x: (B, input_size) float32.  Returns (B, 4) float32."""
    w1, b1, w2, b2, w3, b3 = params
    B, in_size = x.shape

    tile_m, num_tiles, b_pad = _choose_tiling(B)
    if b_pad != B:
        x = jnp.pad(x, ((0, b_pad - B), (0, 0)))

    flops = 2 * b_pad * (in_size * HIDDEN + HIDDEN * HIDDEN + HIDDEN * OUT_PAD)
    bytes_accessed = (
        x.size * 4 + b_pad * OUT_STORE * 4
        + (w1.size + w2.size + w3.size) * 2            # bf16 weights
        + (b1.size + b2.size + b3.size) * 4)           # f32 biases

    out = pl.pallas_call(
        mlp_kernel,
        out_shape=jax.ShapeDtypeStruct((b_pad, OUT_STORE), jnp.float32),
        grid=(num_tiles,),
        in_specs=[
            pl.BlockSpec((tile_m, in_size), lambda i: (i, 0)),    # x: streamed
            pl.BlockSpec((in_size, HIDDEN), lambda i: (0, 0)),    # w1: resident
            pl.BlockSpec((1, HIDDEN), lambda i: (0, 0)),          # b1
            pl.BlockSpec((HIDDEN, HIDDEN), lambda i: (0, 0)),     # w2
            pl.BlockSpec((1, HIDDEN), lambda i: (0, 0)),          # b2
            pl.BlockSpec((HIDDEN, OUT_PAD), lambda i: (0, 0)),    # w3 (lane-padded)
            pl.BlockSpec((1, OUT_STORE), lambda i: (0, 0)),       # b3 (width 8)
        ],
        out_specs=pl.BlockSpec((tile_m, OUT_STORE), lambda i: (i, 0)),
        compiler_params=pltpu.CompilerParams(
            dimension_semantics=("parallel",)),
        cost_estimate=pl.CostEstimate(
            flops=flops, transcendentals=0, bytes_accessed=bytes_accessed),
    )(x, w1, b1, w2, b2, w3, b3)

    return out[:B, :OUT]


def make_params(input_size, key):
    """Deterministic synthetic parameters (PyTorch-Linear-like uniform init).

    Weights stored pre-transposed as (in, out) in bf16; biases in f32.
    fc3 weight is zero-padded to OUT_PAD lanes; fc3 bias to OUT_STORE lanes.
    """
    ks = jax.random.split(key, 6)

    def lin(kw, kb, fan_in, fan_out, w_pad=None, b_pad=None):
        bound = 1.0 / float(fan_in) ** 0.5
        w = jax.random.uniform(kw, (fan_in, fan_out), jnp.float32, -bound, bound)
        b = jax.random.uniform(kb, (1, fan_out), jnp.float32, -bound, bound)
        if w_pad is not None and w_pad > fan_out:
            w = jnp.pad(w, ((0, 0), (0, w_pad - fan_out)))
        if b_pad is not None and b_pad > fan_out:
            b = jnp.pad(b, ((0, 0), (0, b_pad - fan_out)))
        return w.astype(jnp.bfloat16), b  # bias stays f32

    w1, b1 = lin(ks[0], ks[1], input_size, HIDDEN)
    w2, b2 = lin(ks[2], ks[3], HIDDEN, HIDDEN)
    w3, b3 = lin(ks[4], ks[5], HIDDEN, OUT, w_pad=OUT_PAD, b_pad=OUT_STORE)
    return (w1, b1, w2, b2, w3, b3)


def reference_forward(x, params):
    """Pure-JAX reference with the same dtype path as the kernel."""
    w1, b1, w2, b2, w3, b3 = params
    h1 = jnp.dot(x.astype(jnp.bfloat16), w1,
                 preferred_element_type=jnp.float32) + b1
    h1 = jnp.maximum(h1, 0.0)
    h2 = jnp.dot(h1.astype(jnp.bfloat16), w2,
                 preferred_element_type=jnp.float32) + b2
    h2 = jnp.maximum(h2, 0.0)
    o = jnp.dot(h2.astype(jnp.bfloat16), w3,
                preferred_element_type=jnp.float32)
    return o[:, :OUT] + b3[:, :OUT]


if __name__ == "__main__":
    key = jax.random.PRNGKey(0)
    k_x, k_x2, k_p = jax.random.split(key, 3)

    input_size = 32  # e.g. flattened per-person keypoint vector
    params = make_params(input_size, k_p)

    # Small per-frame batch (typical demo case): single tile, no padding waste.
    batch = 8
    x = jax.random.normal(k_x, (batch, input_size), dtype=jnp.float32)
    out = jax.block_until_ready(neural_net_forward(x, params))
    ref = reference_forward(x, params)
    assert out.shape == (batch, OUT)
    assert jnp.allclose(out, ref, atol=1e-3, rtol=1e-3)

    # Larger batch exercising balanced 2-way tiling (300 -> 2 x 152 = 304 rows).
    batch2 = 300
    x2 = jax.random.normal(k_x2, (batch2, input_size), dtype=jnp.float32)
    out2 = jax.block_until_ready(neural_net_forward(x2, params))
    ref2 = reference_forward(x2, params)
    assert out2.shape == (batch2, OUT)
    assert jnp.allclose(out2, ref2, atol=1e-3, rtol=1e-3)

    print("KERNEL_OK")
</pallas_src>

<mosaic_0001>
module attributes {stable_mosaic.version = 11 : i64} {
  func.func @mlp_kernel(%arg0: i32, %arg1: memref<8x32xf32, #tpu.memory_space<vmem>>, %arg2: memref<32x512xbf16, #tpu.memory_space<vmem>>, %arg3: memref<1x512xf32, #tpu.memory_space<vmem>>, %arg4: memref<512x512xbf16, #tpu.memory_space<vmem>>, %arg5: memref<1x512xf32, #tpu.memory_space<vmem>>, %arg6: memref<512x128xbf16, #tpu.memory_space<vmem>>, %arg7: memref<1x8xf32, #tpu.memory_space<vmem>>, %arg8: memref<8x8xf32, #tpu.memory_space<vmem>>) attributes {dimension_semantics = [#tpu.dimension_semantics<parallel>], iteration_bounds = array<i64: 1>, scalar_prefetch = 0 : i64, scratch_operands = 0 : i64, tpu.core_type = #tpu.core_type<tc>, window_params = [{transform_indices = @transform_0, window_bounds = array<i64: 8, 32>}, {pipeline_mode = #tpu.pipeline_mode<synchronous>, transform_indices = @transform_1, window_bounds = array<i64: 32, 512>}, {pipeline_mode = #tpu.pipeline_mode<synchronous>, transform_indices = @transform_2, window_bounds = array<i64: 1, 512>}, {pipeline_mode = #tpu.pipeline_mode<synchronous>, transform_indices = @transform_3, window_bounds = array<i64: 512, 512>}, {pipeline_mode = #tpu.pipeline_mode<synchronous>, transform_indices = @transform_4, window_bounds = array<i64: 1, 512>}, {pipeline_mode = #tpu.pipeline_mode<synchronous>, transform_indices = @transform_5, window_bounds = array<i64: 512, 128>}, {pipeline_mode = #tpu.pipeline_mode<synchronous>, transform_indices = @transform_6, window_bounds = array<i64: 1, 8>}, {transform_indices = @transform_7, window_bounds = array<i64: 8, 8>}]} {
    %c0 = arith.constant 0 : index
    %c0_0 = arith.constant 0 : index
    %0 = vector.load %arg1[%c0, %c0_0] : memref<8x32xf32, #tpu.memory_space<vmem>>, vector<8x32xf32>
    %1 = arith.truncf %0 : vector<8x32xf32> to vector<8x32xbf16>
    %c0_1 = arith.constant 0 : index
    %c0_2 = arith.constant 0 : index
    %2 = vector.load %arg2[%c0_1, %c0_2] : memref<32x512xbf16, #tpu.memory_space<vmem>>, vector<32x512xbf16>
    %cst = arith.constant dense<0.000000e+00> : vector<8x512xf32>
    %3 = tpu.matmul %1, %2, %cst {dimension_numbers = #tpu.dot_dimension_numbers<[1], [0], [0], [1], [0, 0, 1, 1], [], []>} : vector<8x32xbf16>, vector<32x512xbf16>, vector<8x512xf32> -> vector<8x512xf32>
    %c0_3 = arith.constant 0 : index
    %c0_4 = arith.constant 0 : index
    %4 = vector.load %arg3[%c0_3, %c0_4] : memref<1x512xf32, #tpu.memory_space<vmem>>, vector<1x512xf32>
    %5 = vector.broadcast %4 : vector<1x512xf32> to vector<8x512xf32>
    %6 = arith.addf %3, %5 : vector<8x512xf32>
    %cst_5 = arith.constant 0.000000e+00 : f32
    %7 = vector.broadcast %cst_5 : f32 to vector<8x512xf32>
    %8 = arith.maximumf %6, %7 : vector<8x512xf32>
    %9 = arith.truncf %8 : vector<8x512xf32> to vector<8x512xbf16>
    %c0_6 = arith.constant 0 : index
    %c0_7 = arith.constant 0 : index
    %10 = vector.load %arg4[%c0_6, %c0_7] : memref<512x512xbf16, #tpu.memory_space<vmem>>, vector<512x512xbf16>
    %cst_8 = arith.constant dense<0.000000e+00> : vector<8x512xf32>
    %11 = tpu.matmul %9, %10, %cst_8 {dimension_numbers = #tpu.dot_dimension_numbers<[1], [0], [0], [1], [0, 0, 1, 1], [], []>} : vector<8x512xbf16>, vector<512x512xbf16>, vector<8x512xf32> -> vector<8x512xf32>
    %c0_9 = arith.constant 0 : index
    %c0_10 = arith.constant 0 : index
    %12 = vector.load %arg5[%c0_9, %c0_10] : memref<1x512xf32, #tpu.memory_space<vmem>>, vector<1x512xf32>
    %13 = vector.broadcast %12 : vector<1x512xf32> to vector<8x512xf32>
    %14 = arith.addf %11, %13 : vector<8x512xf32>
    %cst_11 = arith.constant 0.000000e+00 : f32
    %15 = vector.broadcast %cst_11 : f32 to vector<8x512xf32>
    %16 = arith.maximumf %14, %15 : vector<8x512xf32>
    %17 = arith.truncf %16 : vector<8x512xf32> to vector<8x512xbf16>
    %c0_12 = arith.constant 0 : index
    %c0_13 = arith.constant 0 : index
    %18 = vector.load %arg6[%c0_12, %c0_13] : memref<512x128xbf16, #tpu.memory_space<vmem>>, vector<512x128xbf16>
    %cst_14 = arith.constant dense<0.000000e+00> : vector<8x128xf32>
    %19 = tpu.matmul %17, %18, %cst_14 {dimension_numbers = #tpu.dot_dimension_numbers<[1], [0], [0], [1], [0, 0, 1, 1], [], []>} : vector<8x512xbf16>, vector<512x128xbf16>, vector<8x128xf32> -> vector<8x128xf32>
    %20 = vector.extract_strided_slice %19 {offsets = [0, 0], sizes = [8, 8], strides = [1, 1]} : vector<8x128xf32> to vector<8x8xf32>
    %c0_15 = arith.constant 0 : index
    %c0_16 = arith.constant 0 : index
    %21 = vector.load %arg7[%c0_15, %c0_16] : memref<1x8xf32, #tpu.memory_space<vmem>>, vector<1x8xf32>
    %22 = vector.broadcast %21 : vector<1x8xf32> to vector<8x8xf32>
    %23 = arith.addf %20, %22 : vector<8x8xf32>
    %c0_17 = arith.constant 0 : index
    %c0_18 = arith.constant 0 : index
    %24 = vector.load %arg8[%c0_17, %c0_18] : memref<8x8xf32, #tpu.memory_space<vmem>>, vector<8x8xf32>
    tpu.vector_store %arg8[%c0_17, %c0_18], %23 {strides = array<i32>} : memref<8x8xf32, #tpu.memory_space<vmem>>, vector<8x8xf32>,
    return
  }
  func.func @transform_0(%arg0: i32) -> (i32, i32) {
    %c0_i32 = arith.constant 0 : i32
    %c0_i32_0 = arith.constant 0 : i32
    return %arg0, %c0_i32 : i32, i32
  }
  func.func @transform_1(%arg0: i32) -> (i32, i32) {
    %c0_i32 = arith.constant 0 : i32
    %c0_i32_0 = arith.constant 0 : i32
    %c0_i32_1 = arith.constant 0 : i32
    return %c0_i32, %c0_i32_0 : i32, i32
  }
  func.func @transform_2(%arg0: i32) -> (i32, i32) {
    %c0_i32 = arith.constant 0 : i32
    %c0_i32_0 = arith.constant 0 : i32
    %c0_i32_1 = arith.constant 0 : i32
    return %c0_i32, %c0_i32_0 : i32, i32
  }
  func.func @transform_3(%arg0: i32) -> (i32, i32) {
    %c0_i32 = arith.constant 0 : i32
    %c0_i32_0 = arith.constant 0 : i32
    %c0_i32_1 = arith.constant 0 : i32
    return %c0_i32, %c0_i32_0 : i32, i32
  }
  func.func @transform_4(%arg0: i32) -> (i32, i32) {
    %c0_i32 = arith.constant 0 : i32
    %c0_i32_0 = arith.constant 0 : i32
    %c0_i32_1 = arith.constant 0 : i32
    return %c0_i32, %c0_i32_0 : i32, i32
  }
  func.func @transform_5(%arg0: i32) -> (i32, i32) {
    %c0_i32 = arith.constant 0 : i32
    %c0_i32_0 = arith.constant 0 : i32
    %c0_i32_1 = arith.constant 0 : i32
    return %c0_i32, %c0_i32_0 : i32, i32
  }
  func.func @transform_6(%arg0: i32) -> (i32, i32) {
    %c0_i32 = arith.constant 0 : i32
    %c0_i32_0 = arith.constant 0 : i32
    %c0_i32_1 = arith.constant 0 : i32
    return %c0_i32, %c0_i32_0 : i32, i32
  }
  func.func @transform_7(%arg0: i32) -> (i32, i32) {
    %c0_i32 = arith.constant 0 : i32
    %c0_i32_0 = arith.constant 0 : i32
    return %arg0, %c0_i32 : i32, i32
  }
}

</mosaic_0001>

<bundles_post_ra>
// kernel: neural_net_forward.1
= control target key start
LH: loop header
LB: loop body
LE: loop exit
PB: predicated region body
PF: predicated region fallthrough
CT: control target
= control target key end

     0   :  { %12 = vsyncpa [#allocation3], 0  ;;  %s2273_s0 = inlined_call_operand.hbm [shape: f32[8,32], index: 0, kind: input, shape index: {}]   ;;  %s2274_s1 = inlined_call_operand.hbm [shape: bf16[32,512], index: 1, kind: input, shape index: {}]   ;;  %s2275_s2 = inlined_call_operand.vmem [shape: f32[1,512], index: 2, kind: input, shape index: {}]   ;;  %s2276_s3 = inlined_call_operand.hbm [shape: bf16[512,512], index: 3, kind: input, shape index: {}]   ;;  %s2277_s4 = inlined_call_operand.vmem [shape: f32[1,512], index: 4, kind: input, shape index: {}]   ;;  %s2278_s5 = inlined_call_operand.hbm [shape: bf16[512,128], index: 5, kind: input, shape index: {}]   ;;  %s2279_s6 = inlined_call_operand.vmem [shape: f32[1,8], index: 6, kind: input, shape index: {}]   ;;  %s2280_s7 = inlined_call_operand.vmem [shape: f32[8,8], index: 7, kind: output, shape index: {}]  }
   0x1   :  { %13 = vsyncpa [#allocation5], 0 }
   0x2   :  { %14 = vsyncpa [#allocation8], 0  ;;  %s2127_s24 = smov [#allocation4]   ;;  %s2033_s28 = scalar_lea.hbm %s2274_s1, 1024 }
   0x3   :  { %s30_s25 = sshll.u32 %s2127_s24, 4  ;;  %p2034_p0 = scmp.ne.s32.totalorder %s2274_s1, %s2033_s28  ;;  %s31_s25 = int_to_ptr.vmem [resolvable:$true] %s30_s25 }
   0x4   :  { %p2037_p1 = scmp.lt.u32.totalorder %s2033_s28, %s2274_s1 }
   0x6   :  { %p2039_p2 = pnand %p2037_p1, %p2034_p0 }
   0x8   :  { %2042 = shalt.err (!%p2039_p2)
}
   0x9   :  { %s2043_s10 = scalar_lea.vmem %s31_s25, 1024  ;;  %p2048_p4 = scmp.lt.s32.totalorder %s31_s25, %s31_s25 }
   0xa   :  { %p2044_p3 = scmp.ne.s32.totalorder %s31_s25, %s2043_s10  ;;  %p2049_p5 = scmp.lt.s32.totalorder %s2043_s10, %s2043_s10 }
   0xc   :  { %p2050_p6 = por %p2049_p5, %p2048_p4 }
   0xe   :  { %p2051_p7 = pnand %p2050_p6, %p2044_p3 }
  0x10   :  { %2054 = shalt.err (!%p2051_p7)
}
  0x11   :  { %s2128_s11 = smov 256   ;;  %s2129_s12 = smov 16  }
  0x12   :  { %36 = dma.hbm_to_vmem [thread:$0]  %s2274_s1, 1024, %s31_s25, [#allocation5], %s2128_s11, %s2128_s11, %s2129_s12  }
  0x13   :  { %s2130_s15 = smov [#allocation2]   ;;  %s2131_s17 = smov [#allocation6]  }
  0x14   :  { %s21_s16 = sshll.u32 %s2130_s15, 4  ;;  %s44_s18 = sshll.u32 %s2131_s17, 4  ;;  %s22_s16 = int_to_ptr.vmem [resolvable:$true] %s21_s16  ;;  %s45_s18 = int_to_ptr.vmem [resolvable:$true] %s44_s18 }
  0x15   :  { %s2055_s21 = scalar_lea.hbm %s2273_s0, 128 }
  0x16   :  { %p2056_p8 = scmp.ne.s32.totalorder %s2273_s0, %s2055_s21  ;;  %p2059_p9 = scmp.lt.u32.totalorder %s2055_s21, %s2273_s0 }
  0x18   :  { %p2061_p10 = pnand %p2059_p9, %p2056_p8 }
  0x1a   :  { %2064 = shalt.err (!%p2061_p10)
}
  0x1b   :  { %s2065_s1 = scalar_lea.vmem %s22_s16, 128  ;;  %p2070_p12 = scmp.lt.s32.totalorder %s22_s16, %s22_s16 }
  0x1c   :  { %p2066_p11 = scmp.ne.s32.totalorder %s22_s16, %s2065_s1  ;;  %p2071_p13 = scmp.lt.s32.totalorder %s2065_s1, %s2065_s1 }
  0x1e   :  { %p2072_p0 = por %p2071_p13, %p2070_p12 }
  0x20   :  { %p2073_p1 = pnand %p2072_p0, %p2066_p11 }
  0x22   :  { %2076 = shalt.err (!%p2073_p1)
}
  0x23   :  { %24 = dma.hbm_to_vmem [thread:$0]  %s2273_s0, 128, %s22_s16, [#allocation3]  }
  0x24   :  { %s2077_s30 = scalar_lea.hbm %s2276_s3, 16384 }
  0x25   :  { %p2078_p2 = scmp.ne.s32.totalorder %s2276_s3, %s2077_s30  ;;  %p2081_p3 = scmp.lt.u32.totalorder %s2077_s30, %s2276_s3 }
  0x27   :  { %p2083_p4 = pnand %p2081_p3, %p2078_p2 }
  0x29   :  { %2086 = shalt.err (!%p2083_p4)
}
  0x2a   :  { %s2087_s14 = scalar_lea.vmem %s45_s18, 16384  ;;  %p2092_p6 = scmp.lt.s32.totalorder %s45_s18, %s45_s18 }
  0x2b   :  { %p2088_p5 = scmp.ne.s32.totalorder %s45_s18, %s2087_s14  ;;  %p2093_p7 = scmp.lt.s32.totalorder %s2087_s14, %s2087_s14 }
  0x2d   :  { %p2094_p8 = por %p2093_p7, %p2092_p6 }
  0x2f   :  { %p2095_p9 = pnand %p2094_p8, %p2088_p5 }
  0x31   :  { %2098 = shalt.err (!%p2095_p9)
}
  0x32   :  { %50 = dma.hbm_to_vmem [thread:$0]  %s2276_s3, 16384, %s45_s18, [#allocation5], %s2128_s11, %s2128_s11, %s2129_s12  }
  0x33   :  { %s2132_s16 = smov [#allocation7]   ;;  %s2099_s21 = scalar_lea.hbm %s2278_s5, 4096 }
  0x34   :  { %s58_s17 = sshll.u32 %s2132_s16, 4  ;;  %p2100_p10 = scmp.ne.s32.totalorder %s2278_s5, %s2099_s21  ;;  %s59_s17 = int_to_ptr.vmem [resolvable:$true] %s58_s17 }
  0x35   :  { %p2103_p11 = scmp.lt.u32.totalorder %s2099_s21, %s2278_s5 }
  0x37   :  { %p2105_p12 = pnand %p2103_p11, %p2100_p10 }
  0x39   :  { %2108 = shalt.err (!%p2105_p12)
}
  0x3a   :  { %s2109_s1 = scalar_lea.vmem %s59_s17, 4096  ;;  %p2114_p0 = scmp.lt.s32.totalorder %s59_s17, %s59_s17 }
  0x3b   :  { %p2110_p13 = scmp.ne.s32.totalorder %s59_s17, %s2109_s1  ;;  %p2115_p1 = scmp.lt.s32.totalorder %s2109_s1, %s2109_s1 }
  0x3d   :  { %p2116_p2 = por %p2115_p1, %p2114_p0 }
  0x3f   :  { %p2117_p3 = pnand %p2116_p2, %p2110_p13 }
  0x41   :  { %2120 = shalt.err (!%p2117_p3)
}
  0x42   :  { %s2133_s3 = smov 64   ;;  %s2134_s11 = smov 4  }
  0x43   :  { %64 = dma.hbm_to_vmem [thread:$0]  %s2278_s5, 4096, %s59_s17, [#allocation8], %s2133_s3, %s2133_s3, %s2134_s11  }
  0x44   :  { %2121 = dma.done.wait [#allocation3], 128  }
  0x45   :  { %2122 = vsyncadd [#allocation3], 4294967168 }
  0x46   :  { %2123 = dma.done.wait [#allocation5], 17408  }
  0x47   :  { %2124 = vsyncadd [#allocation5], 4294949888 }
  0x48   :  { %2125 = dma.done.wait [#allocation8], 4096  }
  0x49   :  { %2126 = vsyncadd [#allocation8], 4294963200  ;;  %v2135_v0 = vmov 0   ;;  %v1797_v1 = vld [vmem:[#allocation4 + $0x4] ss:$16 sps:$4 sm:$0xff]   ;;  %v80_v5 = vld [vmem:[#allocation2] sm:$0xff] }
  0x4a   :  { %188 = vmatprep.mubr.bf16.mxu0 %v2135_v0  ;;  %229 = vmatprep.mubr.bf16.mxu1 %v2135_v0  ;;  %v1799_v2 = vld [vmem:[#allocation4] ss:$16 sps:$4 sm:$0xff]   ;;  %v1800_v3 = vld [vmem:[#allocation4 + $0x24] ss:$16 sps:$4 sm:$0xff]   ;;  %v1803_v6 = vld [vmem:[#allocation4 + $0xc] ss:$16 sps:$4 sm:$0xff]   ;;  %v81_v9 = vpack.c.bf16 %v80_v5, %v80_v5 }
  0x4b   :  { %156 = vmatprep.subr.bf16.mxu0 %v1797_v1  ;;  %v1802_v4 = vld [vmem:[#allocation4 + $0x20] ss:$16 sps:$4 sm:$0xff]   ;;  %v1805_v7 = vld [vmem:[#allocation4 + $0x8] ss:$16 sps:$4 sm:$0xff]   ;;  %197 = vmatprep.subr.bf16.mxu1 %v1803_v6  ;;  %v1806_v8 = vld [vmem:[#allocation4 + $0x2c] ss:$16 sps:$4 sm:$0xff]  }
  0x4c   :  { %157 = vmatpush1.bf16.msra.mxu0 %v1799_v2  ;;  %198 = vmatpush1.bf16.msra.mxu1 %v1805_v7  ;;  %v1808_v10 = vld [vmem:[#allocation4 + $0x28] ss:$16 sps:$4 sm:$0xff]   ;;  %v1811_v11 = vld [vmem:[#allocation6 + $0x4] ss:$16 sps:$4 sm:$0xff]   ;;  %vm152_vm0 = vcmask 261120   ;;  %vm1552_vm1 = vcmask 64512  }
  0x4d   :  { %158 = vmatprep.subr.bf16.mxu0 %v1800_v3  ;;  %199 = vmatprep.subr.bf16.mxu1 %v1806_v8  ;;  %v1809_v12 = vld [vmem:[#allocation6] ss:$16 sps:$4 sm:$0xff]   ;;  %v1814_v13 = vld [vmem:[#allocation6 + $0xc] ss:$16 sps:$4 sm:$0xff]   ;;  %v1817_v14 = vld [vmem:[#allocation6 + $0x24] ss:$16 sps:$4 sm:$0xff]  }
  0x4e   :  { %v1812_v15 = vld [vmem:[#allocation6 + $0x8] ss:$16 sps:$4 sm:$0xff]   ;;  %v1815_v16 = vld [vmem:[#allocation6 + $0x20] ss:$16 sps:$4 sm:$0xff]   ;;  %v1820_v17 = vld [vmem:[#allocation6 + $0x2c] ss:$16 sps:$4 sm:$0xff]  }
  0x4f   :  { %v1823_v18 = vld [vmem:[#allocation6 + $0x44] ss:$16 sps:$4 sm:$0xff]   ;;  %v1818_v19 = vld [vmem:[#allocation6 + $0x28] ss:$16 sps:$4 sm:$0xff]   ;;  %v1821_v20 = vld [vmem:[#allocation6 + $0x40] ss:$16 sps:$4 sm:$0xff]  }
  0x50   :  { %159 = vmatpush1.bf16.msra.mxu0 %v1802_v4  ;;  %200 = vmatpush1.bf16.msra.mxu1 %v1808_v10  ;;  %v1826_v21 = vld [vmem:[#allocation6 + $0x4c] ss:$16 sps:$4 sm:$0xff]   ;;  %v1829_v22 = vld [vmem:[#allocation6 + $0x64] ss:$16 sps:$4 sm:$0xff]   ;;  %v1824_v23 = vld [vmem:[#allocation6 + $0x48] ss:$16 sps:$4 sm:$0xff]  }
  0x51   :  { %1036 = vmatprep.subr.bf16.mxu0 %v1811_v11  ;;  %1118 = vmatprep.subr.bf16.mxu1 %v1814_v13  ;;  %v1827_v24 = vld [vmem:[#allocation6 + $0x60] ss:$16 sps:$4 sm:$0xff]   ;;  %v1832_v25 = vld [vmem:[#allocation6 + $0x6c] ss:$16 sps:$4 sm:$0xff]   ;;  %v1835_v26 = vld [vmem:[#allocation6 + $0x84] ss:$16 sps:$4 sm:$0xff]   ;;  %v92_v13 = vlaneseq }
  0x52   :  { %v1830_v27 = vld [vmem:[#allocation6 + $0x68] ss:$16 sps:$4 sm:$0xff]   ;;  %v1833_v28 = vld [vmem:[#allocation6 + $0x80] ss:$16 sps:$4 sm:$0xff]   ;;  %v1838_v29 = vld [vmem:[#allocation6 + $0x8c] ss:$16 sps:$4 sm:$0xff]  }
  0x53   :  { %1569 = vmatmul.mubr.msk.bf16.vlgmr.msra.gmra.mrb[0].mxu0 %vm152_vm0, %v81_v9  ;;  %1570 = vmatmul.mubr.msk.bf16.vlgmr.msra.gmra.mrb[0].mxu1 %vm152_vm0, %v81_v9  ;;  %v1841_v30 = vld [vmem:[#allocation6 + $0xa4] ss:$16 sps:$4 sm:$0xff]   ;;  %v1836_v31 = vld [vmem:[#allocation6 + $0x88] ss:$16 sps:$4 sm:$0xff]   ;;  %v1839_v32 = vld [vmem:[#allocation6 + $0xa0] ss:$16 sps:$4 sm:$0xff]  }
  0x54   :  { %1037 = vmatpush1.bf16.msra.mxu0 %v1809_v12  ;;  %1119 = vmatpush1.bf16.msra.mxu1 %v1812_v15  ;;  %v1844_v33 = vld [vmem:[#allocation6 + $0xac] ss:$16 sps:$4 sm:$0xff]   ;;  %v1847_v34 = vld [vmem:[#allocation6 + $0xc4] ss:$16 sps:$4 sm:$0xff]   ;;  %v1842_v35 = vld [vmem:[#allocation6 + $0xa8] ss:$16 sps:$4 sm:$0xff]  }
  0x55   :  { %1038 = vmatprep.subr.bf16.mxu0 %v1817_v14  ;;  %1120 = vmatprep.subr.bf16.mxu1 %v1820_v17  ;;  %v1845_v36 = vld [vmem:[#allocation6 + $0xc0] ss:$16 sps:$4 sm:$0xff]   ;;  %v1850_v37 = vld [vmem:[#allocation6 + $0xcc] ss:$16 sps:$4 sm:$0xff]   ;;  %v1853_v38 = vld [vmem:[#allocation6 + $0xe4] ss:$16 sps:$4 sm:$0xff]  }
  0x56   :  { %v1848_v39 = vld [vmem:[#allocation6 + $0xc8] ss:$16 sps:$4 sm:$0xff]   ;;  %v1851_v40 = vld [vmem:[#allocation6 + $0xe0] ss:$16 sps:$4 sm:$0xff]   ;;  %v1856_v41 = vld [vmem:[#allocation6 + $0xec] ss:$16 sps:$4 sm:$0xff]  }
  0x57   :  { %v1859_v42 = vld [vmem:[#allocation6 + $0x104] ss:$16 sps:$4 sm:$0xff]   ;;  %v1854_v43 = vld [vmem:[#allocation6 + $0xe8] ss:$16 sps:$4 sm:$0xff]   ;;  %v1857_v44 = vld [vmem:[#allocation6 + $0x100] ss:$16 sps:$4 sm:$0xff]  }
  0x58   :  { %1039 = vmatpush1.bf16.msra.mxu0 %v1815_v16  ;;  %1121 = vmatpush1.bf16.msra.mxu1 %v1818_v19  ;;  %v1862_v45 = vld [vmem:[#allocation6 + $0x10c] ss:$16 sps:$4 sm:$0xff]   ;;  %v1865_v46 = vld [vmem:[#allocation6 + $0x124] ss:$16 sps:$4 sm:$0xff]   ;;  %v1860_v47 = vld [vmem:[#allocation6 + $0x108] ss:$16 sps:$4 sm:$0xff]  }
  0x59   :  { %1040 = vmatprep.subr.bf16.mxu0 %v1823_v18  ;;  %1122 = vmatprep.subr.bf16.mxu1 %v1826_v21  ;;  %v1863_v48 = vld [vmem:[#allocation6 + $0x120] ss:$16 sps:$4 sm:$0xff]   ;;  %v1868_v49 = vld [vmem:[#allocation6 + $0x12c] ss:$16 sps:$4 sm:$0xff]   ;;  %v1871_v50 = vld [vmem:[#allocation6 + $0x144] ss:$16 sps:$4 sm:$0xff]  }
  0x5a   :  { %v1866_v51 = vld [vmem:[#allocation6 + $0x128] ss:$16 sps:$4 sm:$0xff]   ;;  %v1869_v52 = vld [vmem:[#allocation6 + $0x140] ss:$16 sps:$4 sm:$0xff]   ;;  %v1874_v53 = vld [vmem:[#allocation6 + $0x14c] ss:$16 sps:$4 sm:$0xff]  }
  0x5b   :  { %v1877_v54 = vld [vmem:[#allocation6 + $0x164] ss:$16 sps:$4 sm:$0xff]   ;;  %v1872_v55 = vld [vmem:[#allocation6 + $0x148] ss:$16 sps:$4 sm:$0xff]   ;;  %v1875_v56 = vld [vmem:[#allocation6 + $0x160] ss:$16 sps:$4 sm:$0xff]  }
  0x5c   :  { %1041 = vmatpush1.bf16.msra.mxu0 %v1821_v20  ;;  %1123 = vmatpush1.bf16.msra.mxu1 %v1824_v23  ;;  %v1880_v57 = vld [vmem:[#allocation6 + $0x16c] ss:$16 sps:$4 sm:$0xff]   ;;  %v1883_v58 = vld [vmem:[#allocation6 + $0x184] ss:$16 sps:$4 sm:$0xff]   ;;  %v1878_v59 = vld [vmem:[#allocation6 + $0x168] ss:$16 sps:$4 sm:$0xff]  }
  0x5d   :  { %1042 = vmatprep.subr.bf16.mxu0 %v1829_v22  ;;  %1124 = vmatprep.subr.bf16.mxu1 %v1832_v25  ;;  %v1881_v60 = vld [vmem:[#allocation6 + $0x180] ss:$16 sps:$4 sm:$0xff]   ;;  %v1886_v61 = vld [vmem:[#allocation6 + $0x18c] ss:$16 sps:$4 sm:$0xff]   ;;  %v1889_v62 = vld [vmem:[#allocation6 + $0x1a4] ss:$16 sps:$4 sm:$0xff]  }
  0x5e   :  { %v1884_v63 = vld [vmem:[#allocation6 + $0x188] ss:$16 sps:$4 sm:$0xff]   ;;  %v1887_v0 = vld [vmem:[#allocation6 + $0x1a0] ss:$16 sps:$4 sm:$0xff]   ;;  %v1892_v1 = vld [vmem:[#allocation6 + $0x1ac] ss:$16 sps:$4 sm:$0xff]  }
  0x5f   :  { %v1890_v2 = vld [vmem:[#allocation6 + $0x1a8] ss:$16 sps:$4 sm:$0xff]   ;;  %v1895_v3 = vld [vmem:[#allocation6 + $0x1c4] ss:$16 sps:$4 sm:$0xff]   ;;  %v1898_v4 = vld [vmem:[#allocation6 + $0x1cc] ss:$16 sps:$4 sm:$0xff]  }
  0x60   :  { %1043 = vmatpush1.bf16.msra.mxu0 %v1827_v24  ;;  %1125 = vmatpush1.bf16.msra.mxu1 %v1830_v27  ;;  %v1893_v5 = vld [vmem:[#allocation6 + $0x1c0] ss:$16 sps:$4 sm:$0xff]   ;;  %v1896_v6 = vld [vmem:[#allocation6 + $0x1c8] ss:$16 sps:$4 sm:$0xff]   ;;  %v1901_v7 = vld [vmem:[#allocation6 + $0x1e4] ss:$16 sps:$4 sm:$0xff]  }
  0x61   :  { %1044 = vmatprep.subr.bf16.mxu0 %v1835_v26  ;;  %1126 = vmatprep.subr.bf16.mxu1 %v1838_v29  ;;  %v1904_v8 = vld [vmem:[#allocation6 + $0x1ec] ss:$16 sps:$4 sm:$0xff]   ;;  %v1899_v9 = vld [vmem:[#allocation6 + $0x1e0] ss:$16 sps:$4 sm:$0xff]   ;;  %v1902_v10 = vld [vmem:[#allocation6 + $0x1e8] ss:$16 sps:$4 sm:$0xff]  }
  0x62   :  { %v1907_v11 = vld [vmem:[#allocation6 + $0x204] ss:$16 sps:$4 sm:$0xff]   ;;  %v1910_v12 = vld [vmem:[#allocation6 + $0x20c] ss:$16 sps:$4 sm:$0xff]   ;;  %v2230_v14 = vshrl.u32 %v92_v13, 7 }
  0x63   :  { %v2236_v16 = vld [vmem:[%s2275_s2] sm:$0xf]  ;;  %v1967_v13 = vld [vmem:[#allocation6 + $0x344] ss:$16 sps:$4 sm:$0xff]  }
  0x64   :  { %1045 = vmatpush1.bf16.msra.mxu0 %v1833_v28  ;;  %1127 = vmatpush1.bf16.msra.mxu1 %v1836_v31  ;;  %v94_v15 = vsub.s32 0, %v2230_v14  ;;  %v98_v17 = vsub.s32 1, %v2230_v14  ;;  %v106_v19 = vsub.s32 3, %v2230_v14 }
  0x65   :  { %1046 = vmatprep.subr.bf16.mxu0 %v1841_v30  ;;  %1128 = vmatprep.subr.bf16.mxu1 %v1844_v33 }
  0x66   :  { %v95_v18 = vrot.slane %v2236_v16, %v94_v15  ;;  %v99_v20 = vrot.slane %v2236_v16, %v98_v17  ;;  %v107_v24 = vrot.slane %v2236_v16, %v106_v19 }
  0x68   :  { %1047 = vmatpush1.bf16.msra.mxu0 %v1839_v32  ;;  %1129 = vmatpush1.bf16.msra.mxu1 %v1842_v35  ;;  %v1905_v35 = vld [vmem:[#allocation6 + $0x200] ss:$16 sps:$4 sm:$0xff]  }
  0x69   :  { %1048 = vmatprep.subr.bf16.mxu0 %v1847_v34  ;;  %1130 = vmatprep.subr.bf16.mxu1 %v1850_v37 }
  0x6c   :  { %1049 = vmatpush1.bf16.msra.mxu0 %v1845_v36  ;;  %1131 = vmatpush1.bf16.msra.mxu1 %v1848_v39  ;;  %v1908_v36 = vld [vmem:[#allocation6 + $0x208] ss:$16 sps:$4 sm:$0xff]   ;;  %v1913_v39 = vld [vmem:[#allocation6 + $0x224] ss:$16 sps:$4 sm:$0xff]  }
  0x6d   :  { %1050 = vmatprep.subr.bf16.mxu0 %v1853_v38  ;;  %1132 = vmatprep.subr.bf16.mxu1 %v1856_v41 }
  0x70   :  { %1051 = vmatpush1.bf16.msra.mxu0 %v1851_v40  ;;  %1133 = vmatpush1.bf16.msra.mxu1 %v1854_v43  ;;  %v1916_v40 = vld [vmem:[#allocation6 + $0x22c] ss:$16 sps:$4 sm:$0xff]   ;;  %v1911_v43 = vld [vmem:[#allocation6 + $0x220] ss:$16 sps:$4 sm:$0xff]  }
  0x71   :  { %1052 = vmatprep.subr.bf16.mxu0 %v1859_v42  ;;  %1134 = vmatprep.subr.bf16.mxu1 %v1862_v45  ;;  %v1919_v45 = vld [vmem:[#allocation6 + $0x244] ss:$16 sps:$4 sm:$0xff]  }
  0x74   :  { %1053 = vmatpush1.bf16.msra.mxu0 %v1857_v44  ;;  %1135 = vmatpush1.bf16.msra.mxu1 %v1860_v47  ;;  %v1914_v44 = vld [vmem:[#allocation6 + $0x228] ss:$16 sps:$4 sm:$0xff]   ;;  %v1917_v47 = vld [vmem:[#allocation6 + $0x240] ss:$16 sps:$4 sm:$0xff]  }
  0x75   :  { %1054 = vmatprep.subr.bf16.mxu0 %v1865_v46  ;;  %1136 = vmatprep.subr.bf16.mxu1 %v1868_v49  ;;  %v1922_v46 = vld [vmem:[#allocation6 + $0x24c] ss:$16 sps:$4 sm:$0xff]   ;;  %v1925_v49 = vld [vmem:[#allocation6 + $0x264] ss:$16 sps:$4 sm:$0xff]  }
  0x78   :  { %1055 = vmatpush1.bf16.msra.mxu0 %v1863_v48  ;;  %1137 = vmatpush1.bf16.msra.mxu1 %v1866_v51  ;;  %v1920_v48 = vld [vmem:[#allocation6 + $0x248] ss:$16 sps:$4 sm:$0xff]   ;;  %v1923_v51 = vld [vmem:[#allocation6 + $0x260] ss:$16 sps:$4 sm:$0xff]  }
  0x79   :  { %1056 = vmatprep.subr.bf16.mxu0 %v1871_v50  ;;  %1138 = vmatprep.subr.bf16.mxu1 %v1874_v53  ;;  %v1928_v50 = vld [vmem:[#allocation6 + $0x26c] ss:$16 sps:$4 sm:$0xff]   ;;  %v1931_v53 = vld [vmem:[#allocation6 + $0x284] ss:$16 sps:$4 sm:$0xff]  }
  0x7c   :  { %1057 = vmatpush1.bf16.msra.mxu0 %v1869_v52  ;;  %1139 = vmatpush1.bf16.msra.mxu1 %v1872_v55  ;;  %v1926_v52 = vld [vmem:[#allocation6 + $0x268] ss:$16 sps:$4 sm:$0xff]   ;;  %v1929_v55 = vld [vmem:[#allocation6 + $0x280] ss:$16 sps:$4 sm:$0xff]  }
  0x7d   :  { %1058 = vmatprep.subr.bf16.mxu0 %v1877_v54  ;;  %1140 = vmatprep.subr.bf16.mxu1 %v1880_v57  ;;  %v1934_v54 = vld [vmem:[#allocation6 + $0x28c] ss:$16 sps:$4 sm:$0xff]   ;;  %v1937_v57 = vld [vmem:[#allocation6 + $0x2a4] ss:$16 sps:$4 sm:$0xff]  }
  0x80   :  { %1059 = vmatpush1.bf16.msra.mxu0 %v1875_v56  ;;  %1141 = vmatpush1.bf16.msra.mxu1 %v1878_v59  ;;  %v1932_v56 = vld [vmem:[#allocation6 + $0x288] ss:$16 sps:$4 sm:$0xff]   ;;  %v1935_v59 = vld [vmem:[#allocation6 + $0x2a0] ss:$16 sps:$4 sm:$0xff]  }
  0x81   :  { %1060 = vmatprep.subr.bf16.mxu0 %v1883_v58  ;;  %1142 = vmatprep.subr.bf16.mxu1 %v1886_v61  ;;  %v1940_v58 = vld [vmem:[#allocation6 + $0x2ac] ss:$16 sps:$4 sm:$0xff]   ;;  %v1943_v61 = vld [vmem:[#allocation6 + $0x2c4] ss:$16 sps:$4 sm:$0xff]  }
  0x84   :  { %1061 = vmatpush1.bf16.msra.mxu0 %v1881_v60  ;;  %1143 = vmatpush1.bf16.msra.mxu1 %v1884_v63  ;;  %v1938_v60 = vld [vmem:[#allocation6 + $0x2a8] ss:$16 sps:$4 sm:$0xff]   ;;  %v1941_v63 = vld [vmem:[#allocation6 + $0x2c0] ss:$16 sps:$4 sm:$0xff]  }
  0x85   :  { %1062 = vmatprep.subr.bf16.mxu0 %v1889_v62  ;;  %1144 = vmatprep.subr.bf16.mxu1 %v1892_v1  ;;  %v1946_v62 = vld [vmem:[#allocation6 + $0x2cc] ss:$16 sps:$4 sm:$0xff]   ;;  %v1949_v1 = vld [vmem:[#allocation6 + $0x2e4] ss:$16 sps:$4 sm:$0xff]  }
  0x88   :  { %1063 = vmatpush1.bf16.msra.mxu0 %v1887_v0  ;;  %1145 = vmatpush1.bf16.msra.mxu1 %v1890_v2  ;;  %v1944_v0 = vld [vmem:[#allocation6 + $0x2c8] ss:$16 sps:$4 sm:$0xff]   ;;  %v1952_v2 = vld [vmem:[#allocation6 + $0x2ec] ss:$16 sps:$4 sm:$0xff]  }
  0x89   :  { %1064 = vmatprep.subr.bf16.mxu0 %v1895_v3  ;;  %1146 = vmatprep.subr.bf16.mxu1 %v1898_v4  ;;  %v1947_v3 = vld [vmem:[#allocation6 + $0x2e0] ss:$16 sps:$4 sm:$0xff]   ;;  %v1950_v4 = vld [vmem:[#allocation6 + $0x2e8] ss:$16 sps:$4 sm:$0xff]  }
  0x8c   :  { %1065 = vmatpush1.bf16.msra.mxu0 %v1893_v5  ;;  %1147 = vmatpush1.bf16.msra.mxu1 %v1896_v6  ;;  %v1955_v5 = vld [vmem:[#allocation6 + $0x304] ss:$16 sps:$4 sm:$0xff]   ;;  %v1958_v6 = vld [vmem:[#allocation6 + $0x30c] ss:$16 sps:$4 sm:$0xff]  }
  0x8d   :  { %1066 = vmatprep.subr.bf16.mxu0 %v1901_v7  ;;  %1148 = vmatprep.subr.bf16.mxu1 %v1904_v8  ;;  %v1953_v7 = vld [vmem:[#allocation6 + $0x300] ss:$16 sps:$4 sm:$0xff]   ;;  %v1956_v8 = vld [vmem:[#allocation6 + $0x308] ss:$16 sps:$4 sm:$0xff]  }
  0x90   :  { %1067 = vmatpush1.bf16.msra.mxu0 %v1899_v9  ;;  %1149 = vmatpush1.bf16.msra.mxu1 %v1902_v10  ;;  %v1961_v9 = vld [vmem:[#allocation6 + $0x324] ss:$16 sps:$4 sm:$0xff]   ;;  %v1964_v10 = vld [vmem:[#allocation6 + $0x32c] ss:$16 sps:$4 sm:$0xff]  }
  0x91   :  { %1077 = vmatprep.subr.bf16.mxu0 %v1907_v11  ;;  %1159 = vmatprep.subr.bf16.mxu1 %v1910_v12  ;;  %v1959_v11 = vld [vmem:[#allocation6 + $0x320] ss:$16 sps:$4 sm:$0xff]   ;;  %v1962_v12 = vld [vmem:[#allocation6 + $0x328] ss:$16 sps:$4 sm:$0xff]  }
 0x126   :  { %v190_v21 = vpop.f32.mrb[0].mxu0  ;;  %v2249_v29 = vpop.f32.mrb[0].mxu1 }
 0x127   :  { %v191_v22 = vadd.f32 %v190_v21, %v95_v18  ;;  %v192_v23 = vpop.f32.mrb[1].mxu0  ;;  %v233_v31 = vpop.f32.mrb[1].mxu1  ;;  %v1970_v18 = vld [vmem:[#allocation6 + $0x34c] ss:$16 sps:$4 sm:$0xff]   ;;  %v1968_v21 = vld [vmem:[#allocation6 + $0x348] ss:$16 sps:$4 sm:$0xff]  }
 0x128   :  { %v193_v25 = vadd.f32 %v192_v23, %v99_v20  ;;  %v194_v26 = vpop.f32.mrb[2].mxu0  ;;  %v234_v32 = vadd.f32 %v233_v31, %v107_v24  ;;  %v235_v33 = vpop.f32.mrb[2].mxu1  ;;  %v1965_v20 = vld [vmem:[#allocation6 + $0x340] ss:$16 sps:$4 sm:$0xff]   ;;  %v1976_v23 = vld [vmem:[#allocation6 + $0x36c] ss:$16 sps:$4 sm:$0xff]  }
 0x129   :  { %v238_v27 = vmax.f32 %v191_v22, 0.0  ;;  %v195_v28 = vpop.f32.mrb[3].mxu0  ;;  %v236_v37 = vpop.f32.mrb[3].mxu1  ;;  %v1973_v22 = vld [vmem:[#allocation6 + $0x364] ss:$16 sps:$4 sm:$0xff]   ;;  %v102_v31 = vsub.s32 2, %v2230_v14 }
 0x12a   :  { %v239_v30 = vmax.f32 %v193_v25, 0.0  ;;  %v241_v41 = vmax.f32 %v234_v32, 0.0  ;;  %v1971_v24 = vld [vmem:[#allocation6 + $0x360] ss:$16 sps:$4 sm:$0xff]   ;;  %v1974_v25 = vld [vmem:[#allocation6 + $0x368] ss:$16 sps:$4 sm:$0xff]  }
 0x12b   :  { %v242_v38 = vpack.c.bf16 %v238_v27, %v238_v27  ;;  %v1979_v26 = vld [vmem:[#allocation6 + $0x384] ss:$16 sps:$4 sm:$0xff]   ;;  %v1982_v27 = vld [vmem:[#allocation6 + $0x38c] ss:$16 sps:$4 sm:$0xff]   ;;  %v1977_v28 = vld [vmem:[#allocation6 + $0x380] ss:$16 sps:$4 sm:$0xff]  }
 0x12c   :  { %v243_v34 = vpack.c.bf16 %v239_v30, %v239_v30  ;;  %v245_v42 = vpack.c.bf16 %v241_v41, %v241_v41  ;;  %v1980_v30 = vld [vmem:[#allocation6 + $0x388] ss:$16 sps:$4 sm:$0xff]   ;;  %v1985_v32 = vld [vmem:[#allocation6 + $0x3a4] ss:$16 sps:$4 sm:$0xff]   ;;  %v1988_v33 = vld [vmem:[#allocation6 + $0x3ac] ss:$16 sps:$4 sm:$0xff]  }
 0x12d   :  { %v1991_v37 = vld [vmem:[#allocation6 + $0x3c4] ss:$16 sps:$4 sm:$0xff]  }
 0x12e   :  { %1068 = vmatprep.mubr.bf16.mxu0 %v243_v34  ;;  %1150 = vmatprep.mubr.bf16.mxu1 %v243_v34  ;;  %v1983_v34 = vld [vmem:[#allocation6 + $0x3a0] ss:$16 sps:$4 sm:$0xff]  }
 0x12f   :  { %1069 = vmatmul.mubr.bf16.vlgmr.msra.gmra.mrb[4].mxu0 %v242_v38  ;;  %1151 = vmatmul.mubr.bf16.vlgmr.msra.gmra.mrb[4].mxu1 %v242_v38  ;;  %v1994_v38 = vld [vmem:[#allocation6 + $0x3cc] ss:$16 sps:$4 sm:$0xff]  }
 0x130   :  { %1078 = vmatpush1.bf16.msra.mxu0 %v1905_v35  ;;  %1160 = vmatpush1.bf16.msra.mxu1 %v1908_v36  ;;  %v1986_v35 = vld [vmem:[#allocation6 + $0x3a8] ss:$16 sps:$4 sm:$0xff]   ;;  %v103_v36 = vrot.slane %v2236_v16, %v102_v31  ;;  %v2001_v16 = vld [vmem:[#allocation7 + $0x40] sm:$0xff]  }
 0x131   :  { %1079 = vmatprep.subr.bf16.mxu0 %v1913_v39  ;;  %1161 = vmatprep.subr.bf16.mxu1 %v1916_v40  ;;  %v1989_v39 = vld [vmem:[#allocation6 + $0x3c0] ss:$16 sps:$4 sm:$0xff]   ;;  %v1992_v40 = vld [vmem:[#allocation6 + $0x3c8] ss:$16 sps:$4 sm:$0xff]  }
 0x132   :  { %1109 = vmatprep.mubr.bf16.mxu0 %v245_v42  ;;  %1191 = vmatprep.mubr.bf16.mxu1 %v245_v42  ;;  %v232_v41 = vadd.f32 %v2249_v29, %v103_v36  ;;  %v1997_v42 = vld [vmem:[#allocation6 + $0x3e4] ss:$16 sps:$4 sm:$0xff]   ;;  %v2005_v29 = vld [vmem:[#allocation7 + $0x48] sm:$0xff]  }
 0x134   :  { %1080 = vmatpush1.bf16.msra.mxu0 %v1911_v43  ;;  %1162 = vmatpush1.bf16.msra.mxu1 %v1914_v44  ;;  %v2000_v43 = vld [vmem:[#allocation6 + $0x3ec] ss:$16 sps:$4 sm:$0xff]   ;;  %v1995_v44 = vld [vmem:[#allocation6 + $0x3e0] ss:$16 sps:$4 sm:$0xff]  }
 0x135   :  { %1081 = vmatprep.subr.bf16.mxu0 %v1919_v45  ;;  %1163 = vmatprep.subr.bf16.mxu1 %v1922_v46  ;;  %v1998_v45 = vld [vmem:[#allocation6 + $0x3e8] ss:$16 sps:$4 sm:$0xff]   ;;  %v240_v46 = vmax.f32 %v232_v41, 0.0 }
 0x138   :  { %1082 = vmatpush1.bf16.msra.mxu0 %v1917_v47  ;;  %1164 = vmatpush1.bf16.msra.mxu1 %v1920_v48  ;;  %v2002_v47 = vld [vmem:[#allocation7 + $0xc0] sm:$0xff]  }
 0x139   :  { %1083 = vmatprep.subr.bf16.mxu0 %v1925_v49  ;;  %1165 = vmatprep.subr.bf16.mxu1 %v1928_v50  ;;  %v2003_v48 = vld [vmem:[#allocation7] sm:$0xff]   ;;  %v244_v50 = vpack.c.bf16 %v240_v46, %v240_v46 }
 0x13a   :  { %v2004_v49 = vld [vmem:[#allocation7 + $0x80] sm:$0xff]  }
 0x13c   :  { %1084 = vmatpush1.bf16.msra.mxu0 %v1923_v51  ;;  %1166 = vmatpush1.bf16.msra.mxu1 %v1926_v52  ;;  %v2006_v51 = vld [vmem:[#allocation7 + $0xc8] sm:$0xff]  }
 0x13d   :  { %1085 = vmatprep.subr.bf16.mxu0 %v1931_v53  ;;  %1167 = vmatprep.subr.bf16.mxu1 %v1934_v54  ;;  %v2007_v52 = vld [vmem:[#allocation7 + $0x8] sm:$0xff]   ;;  %v2009_v54 = vld [vmem:[#allocation7 + $0x50] sm:$0xff]  }
 0x13e   :  { %v2008_v53 = vld [vmem:[#allocation7 + $0x88] sm:$0xff]  }
 0x140   :  { %1086 = vmatpush1.bf16.msra.mxu0 %v1929_v55  ;;  %1168 = vmatpush1.bf16.msra.mxu1 %v1932_v56  ;;  %v2010_v55 = vld [vmem:[#allocation7 + $0xd0] sm:$0xff]  }
 0x141   :  { %1087 = vmatprep.subr.bf16.mxu0 %v1937_v57  ;;  %1169 = vmatprep.subr.bf16.mxu1 %v1940_v58  ;;  %v2011_v56 = vld [vmem:[#allocation7 + $0x10] sm:$0xff]   ;;  %v2013_v58 = vld [vmem:[#allocation7 + $0x58] sm:$0xff]  }
 0x142   :  { %v2012_v57 = vld [vmem:[#allocation7 + $0x90] sm:$0xff]  }
 0x144   :  { %1088 = vmatpush1.bf16.msra.mxu0 %v1935_v59  ;;  %1170 = vmatpush1.bf16.msra.mxu1 %v1938_v60  ;;  %v2014_v59 = vld [vmem:[#allocation7 + $0xd8] sm:$0xff]  }
 0x145   :  { %1089 = vmatprep.subr.bf16.mxu0 %v1943_v61  ;;  %1171 = vmatprep.subr.bf16.mxu1 %v1946_v62  ;;  %v2015_v60 = vld [vmem:[#allocation7 + $0x18] sm:$0xff]   ;;  %v2017_v62 = vld [vmem:[#allocation7 + $0x60] sm:$0xff]  }
 0x146   :  { %v2016_v61 = vld [vmem:[#allocation7 + $0x98] sm:$0xff]  }
 0x148   :  { %1090 = vmatpush1.bf16.msra.mxu0 %v1941_v63  ;;  %1172 = vmatpush1.bf16.msra.mxu1 %v1944_v0  ;;  %v2018_v63 = vld [vmem:[#allocation7 + $0xe0] sm:$0xff]  }
 0x149   :  { %1091 = vmatprep.subr.bf16.mxu0 %v1949_v1  ;;  %1173 = vmatprep.subr.bf16.mxu1 %v1952_v2  ;;  %v2019_v0 = vld [vmem:[#allocation7 + $0x20] sm:$0xff]   ;;  %v2021_v2 = vld [vmem:[#allocation7 + $0x68] sm:$0xff]  }
 0x14a   :  { %v2020_v1 = vld [vmem:[#allocation7 + $0xa0] sm:$0xff]  }
 0x14c   :  { %1092 = vmatpush1.bf16.msra.mxu0 %v1947_v3  ;;  %1174 = vmatpush1.bf16.msra.mxu1 %v1950_v4  ;;  %v2022_v3 = vld [vmem:[#allocation7 + $0xe8] sm:$0xff]  }
 0x14d   :  { %1093 = vmatprep.subr.bf16.mxu0 %v1955_v5  ;;  %1175 = vmatprep.subr.bf16.mxu1 %v1958_v6  ;;  %v2023_v4 = vld [vmem:[#allocation7 + $0x28] sm:$0xff]   ;;  %v2025_v6 = vld [vmem:[#allocation7 + $0x70] sm:$0xff]  }
 0x14e   :  { %v2024_v5 = vld [vmem:[#allocation7 + $0xa8] sm:$0xff]  }
 0x150   :  { %1094 = vmatpush1.bf16.msra.mxu0 %v1953_v7  ;;  %1176 = vmatpush1.bf16.msra.mxu1 %v1956_v8  ;;  %v2026_v7 = vld [vmem:[#allocation7 + $0xf0] sm:$0xff]  }
 0x151   :  { %1095 = vmatprep.subr.bf16.mxu0 %v1961_v9  ;;  %1177 = vmatprep.subr.bf16.mxu1 %v1964_v10  ;;  %v2027_v8 = vld [vmem:[#allocation7 + $0x30] sm:$0xff]   ;;  %v2029_v10 = vld [vmem:[#allocation7 + $0x78] sm:$0xff]  }
 0x152   :  { %v2028_v9 = vld [vmem:[#allocation7 + $0xb0] sm:$0xff]  }
 0x154   :  { %1096 = vmatpush1.bf16.msra.mxu0 %v1959_v11  ;;  %1178 = vmatpush1.bf16.msra.mxu1 %v1962_v12  ;;  %v2030_v11 = vld [vmem:[#allocation7 + $0xf8] sm:$0xff]  }
 0x155   :  { %1097 = vmatprep.subr.bf16.mxu0 %v1967_v13  ;;  %1179 = vmatprep.subr.bf16.mxu1 %v1970_v18  ;;  %v2031_v12 = vld [vmem:[#allocation7 + $0x38] sm:$0xff]  }
 0x156   :  { %v2032_v13 = vld [vmem:[#allocation7 + $0xb8] sm:$0xff]  }
 0x157   :  { %v374_v18 = vld [vmem:[%s2277_s4] sm:$0xf] }
 0x158   :  { %1098 = vmatpush1.bf16.msra.mxu0 %v1965_v20  ;;  %1180 = vmatpush1.bf16.msra.mxu1 %v1968_v21  ;;  %v379_v20 = vrot.slane %v374_v18, %v94_v15  ;;  %v387_v21 = vrot.slane %v374_v18, %v102_v31 }
 0x159   :  { %1099 = vmatprep.subr.bf16.mxu0 %v1973_v22  ;;  %1181 = vmatprep.subr.bf16.mxu1 %v1976_v23  ;;  %v383_v22 = vrot.slane %v374_v18, %v98_v17  ;;  %v391_v23 = vrot.slane %v374_v18, %v106_v19 }
 0x15c   :  { %1100 = vmatpush1.bf16.msra.mxu0 %v1971_v24  ;;  %1182 = vmatpush1.bf16.msra.mxu1 %v1974_v25 }
 0x15d   :  { %1101 = vmatprep.subr.bf16.mxu0 %v1979_v26  ;;  %1183 = vmatprep.subr.bf16.mxu1 %v1982_v27 }
 0x160   :  { %1102 = vmatpush1.bf16.msra.mxu0 %v1977_v28  ;;  %1184 = vmatpush1.bf16.msra.mxu1 %v1980_v30 }
 0x161   :  { %1103 = vmatprep.subr.bf16.mxu0 %v1985_v32  ;;  %1185 = vmatprep.subr.bf16.mxu1 %v1988_v33 }
 0x164   :  { %1104 = vmatpush1.bf16.msra.mxu0 %v1983_v34  ;;  %1186 = vmatpush1.bf16.msra.mxu1 %v1986_v35 }
 0x165   :  { %1105 = vmatprep.subr.bf16.mxu0 %v1991_v37  ;;  %1187 = vmatprep.subr.bf16.mxu1 %v1994_v38 }
 0x168   :  { %1106 = vmatpush1.bf16.msra.mxu0 %v1989_v39  ;;  %1188 = vmatpush1.bf16.msra.mxu1 %v1992_v40 }
 0x169   :  { %1107 = vmatprep.subr.bf16.mxu0 %v1997_v42  ;;  %1189 = vmatprep.subr.bf16.mxu1 %v2000_v43 }
 0x16c   :  { %1108 = vmatpush1.bf16.msra.mxu0 %v1995_v44  ;;  %1190 = vmatpush1.bf16.msra.mxu1 %v1998_v45 }
 0x16d   :  { %1732 = vmatprep.subr.bf16.mxu0 %v2001_v16  ;;  %1754 = vmatprep.subr.bf16.mxu1 %v2002_v47 }
 0x16f   :  { %1110 = vmatmul.mubr.bf16.vlgmr.msra.gmra.mrb[4].mxu0 %v244_v50  ;;  %1192 = vmatmul.mubr.bf16.vlgmr.msra.gmra.mrb[4].mxu1 %v244_v50 }
 0x170   :  { %1733 = vmatpush3.bf16.msra.mxu0 %v2003_v48  ;;  %1755 = vmatpush3.bf16.msra.mxu1 %v2004_v49  ;;  %v1731_v48 = vld [vmem:[%s2279_s6] ss:$0 sm:$0xff] }
 0x171   :  { %1734 = vmatprep.subr.bf16.mxu0 %v2005_v29  ;;  %1756 = vmatprep.subr.bf16.mxu1 %v2006_v51 }
 0x174   :  { %1735 = vmatpush3.bf16.msra.mxu0 %v2007_v52  ;;  %1757 = vmatpush3.bf16.msra.mxu1 %v2008_v53 }
 0x175   :  { %1736 = vmatprep.subr.bf16.mxu0 %v2009_v54  ;;  %1758 = vmatprep.subr.bf16.mxu1 %v2010_v55 }
 0x178   :  { %1737 = vmatpush3.bf16.msra.mxu0 %v2011_v56  ;;  %1759 = vmatpush3.bf16.msra.mxu1 %v2012_v57 }
 0x179   :  { %1738 = vmatprep.subr.bf16.mxu0 %v2013_v58  ;;  %1760 = vmatprep.subr.bf16.mxu1 %v2014_v59 }
 0x17c   :  { %1739 = vmatpush3.bf16.msra.mxu0 %v2015_v60  ;;  %1761 = vmatpush3.bf16.msra.mxu1 %v2016_v61 }
 0x17d   :  { %1740 = vmatprep.subr.bf16.mxu0 %v2017_v62  ;;  %1762 = vmatprep.subr.bf16.mxu1 %v2018_v63 }
 0x180   :  { %1741 = vmatpush3.bf16.msra.mxu0 %v2019_v0  ;;  %1763 = vmatpush3.bf16.msra.mxu1 %v2020_v1 }
 0x181   :  { %1742 = vmatprep.subr.bf16.mxu0 %v2021_v2  ;;  %1764 = vmatprep.subr.bf16.mxu1 %v2022_v3 }
 0x184   :  { %1743 = vmatpush3.bf16.msra.mxu0 %v2023_v4  ;;  %1765 = vmatpush3.bf16.msra.mxu1 %v2024_v5 }
 0x185   :  { %1744 = vmatprep.subr.bf16.mxu0 %v2025_v6  ;;  %1766 = vmatprep.subr.bf16.mxu1 %v2026_v7 }
 0x188   :  { %1745 = vmatpush3.bf16.msra.mxu0 %v2027_v8  ;;  %1767 = vmatpush3.bf16.msra.mxu1 %v2028_v9 }
 0x189   :  { %1746 = vmatprep.subr.bf16.mxu0 %v2029_v10  ;;  %1768 = vmatprep.subr.bf16.mxu1 %v2030_v11 }
 0x18c   :  { %1747 = vmatpush3.bf16.msra.mxu0 %v2031_v12  ;;  %1769 = vmatpush3.bf16.msra.mxu1 %v2032_v13 }
 0x242   :  { %v1111_v24 = vpop.f32.mrb[4].mxu0  ;;  %v1193_v25 = vpop.f32.mrb[4].mxu1 }
 0x243   :  { %v1776_v26 = vadd.f32 %v1111_v24, %v379_v20  ;;  %v1778_v27 = vadd.f32 %v1193_v25, %v387_v21  ;;  %v1113_v28 = vpop.f32.mrb[5].mxu0  ;;  %v1195_v30 = vpop.f32.mrb[5].mxu1 }
 0x244   :  { %v1777_v32 = vadd.f32 %v1113_v28, %v383_v22  ;;  %v1779_v33 = vadd.f32 %v1195_v30, %v391_v23  ;;  %v1115_v34 = vpop.f32.mrb[6].mxu0  ;;  %v1197_v35 = vpop.f32.mrb[6].mxu1 }
 0x245   :  { %v1200_v15 = vmax.f32 %v1776_v26, 0.0  ;;  %v1202_v36 = vmax.f32 %v1778_v27, 0.0  ;;  %v1116_v37 = vpop.f32.mrb[7].mxu0  ;;  %v1198_v31 = vpop.f32.mrb[7].mxu1 }
 0x246   :  { %v1201_v38 = vmax.f32 %v1777_v32, 0.0  ;;  %v1203_v39 = vmax.f32 %v1779_v33, 0.0 }
 0x247   :  { %v1204_v14 = vpack.c.bf16 %v1200_v15, %v1200_v15  ;;  %v1206_v19 = vpack.c.bf16 %v1202_v36, %v1202_v36 }
 0x248   :  { %v1205_v17 = vpack.c.bf16 %v1201_v38, %v1201_v38  ;;  %v1207_v40 = vpack.c.bf16 %v1203_v39, %v1203_v39 }
 0x24a   :  { %1496 = vmatprep.mubr.bf16.mxu0 %v1205_v17  ;;  %1536 = vmatprep.mubr.bf16.mxu1 %v1207_v40 }
 0x24b   :  { %1497 = vmatmul.mubr.bf16.vlgmr.msra.gmra.mrb[8].mxu0 %v1204_v14  ;;  %1537 = vmatmul.mubr.bf16.vlgmr.msra.gmra.mrb[8].mxu1 %v1206_v19 }
 0x31e   :  { %v1748_v41 = vpop.f32.mrb[8].mxu0  ;;  %v1770_v42 = vpop.f32.mrb[8].mxu1 }
 0x31f   :  { %v1749_v43 = vpop.f32.mrb[9].mxu0  ;;  %v1771_v44 = vpop.f32.mrb[9].mxu1 }
 0x320   :  { %v1750_v45 = vadd.f32 %v1749_v43, %v1748_v41  ;;  %v1772_v46 = vadd.f32 %v1771_v44, %v1770_v42  ;;  %v1751_v16 = vpop.f32.mrb[10].mxu0  ;;  %v1773_v47 = vpop.f32.mrb[10].mxu1 }
 0x321   :  { %v1752_v49 = vpop.f32.mrb[11].mxu0  ;;  %v1774_v50 = vpop.f32.mrb[11].mxu1 }
 0x322   :  { %v1539_v29 = vadd.f32 %v1772_v46, %v1750_v45 }
 0x324   :  { %v1551_v51 = vadd.f32 %v1731_v48, %v1539_v29 }
 0x326   :  { %1553 = vst.msk [vmem:[%s2280_s7] sm:$0xff] %vm1552_vm1, %v1551_v51 }
 0x327   :  { %1558 = vsyncpa [#allocation3], 1 }
 0x328   :  { %1559 = vsyncpa [#allocation5], 1 }
 0x329   :  { %1560 = vsyncpa [#allocation8], 1 }

</bundles_post_ra>
